<compile_context>
chip_gen: v6e
topology: v6e:2x2x1
jax: 0.10.0
libtpu: 0.0.40
codegen_flags: <defaults>
</compile_context>

<pallas_src>
import jax
import jax.numpy as jnp
from jax.experimental import pallas as pl
from jax.experimental.pallas import tpu as pltpu


def _round_up(n, m):
    return ((n + m - 1) // m) * m


def _cdiv(a, b):
    return -(-a // b)


def dqn_kernel(x_ref, w1_ref, b1_ref, w2_ref, b2_ref, o_ref):
    # Transposed layout: batch lives in the LANE (last) axis.
    #   x_ref : (4, TILE_B)  compute dtype     w1_ref: (32, 4)  compute dtype
    #   b1_ref: (32, 1) f32                    w2_ref: (2, 32)  compute dtype
    #   b2_ref: (2, 1)  f32                    o_ref : (2, TILE_B) out dtype
    h = jnp.dot(w1_ref[...], x_ref[...], preferred_element_type=jnp.float32)
    h = jnp.maximum(h + b1_ref[...], 0.0)          # bias + ReLU in f32 (v5e-safe VPU)
    h = h.astype(w2_ref.dtype)                     # pure narrow-input MXU dot for layer 2
    o = jnp.dot(w2_ref[...], h, preferred_element_type=jnp.float32)
    o_ref[...] = (o + b2_ref[...]).astype(o_ref.dtype)
    # TODO(synk): if profiling at large tiles shows the MXU push/pop cadence
    # binding (degenerate 32x4 / 2x32 weights on a 128/256-wide array), move
    # layer 1 to 4 unrolled VPU broadcast-FMAs and keep only layer 2 on the MXU.


def _choose_tile_b(B, tile_b, itemsize_in, itemsize_out, in_dim, out_dim):
    b128 = _round_up(max(B, 1), 128)
    if tile_b is None:
        # Aim for ~1 MiB of HBM traffic per grid step, but keep >= 4 grid steps
        # when the batch is large enough (v7x megacore sharding + pipelining).
        per_lane_bytes = in_dim * itemsize_in + out_dim * itemsize_out
        tile_b = min((1 << 20) // per_lane_bytes, _cdiv(b128, 4))
    # Always a multiple of 128 lanes, never larger than the 128-padded batch.
    tile_b = max(128, _round_up(min(tile_b, b128), 128))
    return tile_b


def dqn_forward_t(x_t, w1, b1, w2, b2, *, tile_b=None,
                  compute_dtype=jnp.bfloat16, out_dtype=jnp.float32):
    """Feature-major hot path: x_t (4, B) -> (2, B).  No wrapper transposes.
    Weights in PyTorch nn.Linear layout: w1 (32, 4), b1 (32,), w2 (2, 32), b2 (2,)."""
    in_dim, B = x_t.shape
    hidden = w1.shape[0]
    out_dim = w2.shape[0]

    it_in = jnp.dtype(compute_dtype).itemsize
    it_out = jnp.dtype(out_dtype).itemsize
    tile_b = _choose_tile_b(B, tile_b, it_in, it_out, in_dim, out_dim)
    b_pad = _round_up(B, tile_b)
    grid = (b_pad // tile_b,)

    x_t = x_t.astype(compute_dtype)
    if b_pad != B:
        x_t = jnp.pad(x_t, ((0, 0), (0, b_pad - B)))
    w1c = w1.astype(compute_dtype)
    w2c = w2.astype(compute_dtype)
    b1c = b1.reshape(hidden, 1).astype(jnp.float32)
    b2c = b2.reshape(out_dim, 1).astype(jnp.float32)

    cost = pl.CostEstimate(
        flops=2 * b_pad * (in_dim * hidden + hidden * out_dim),
        transcendentals=0,
        bytes_accessed=(it_in * b_pad * in_dim                       # x^T stream
                        + it_out * b_pad * out_dim                   # output stream
                        + it_in * (hidden * in_dim + out_dim * hidden)
                        + 4 * (hidden + out_dim)),                   # biases (f32)
    )

    out_t = pl.pallas_call(
        dqn_kernel,
        out_shape=jax.ShapeDtypeStruct((out_dim, b_pad), out_dtype),
        grid_spec=pltpu.PrefetchScalarGridSpec(
            num_scalar_prefetch=0,
            grid=grid,
            in_specs=[
                pl.BlockSpec((in_dim, tile_b), lambda i: (0, i)),   # x^T tile
                pl.BlockSpec((hidden, in_dim), lambda i: (0, 0)),   # w1 resident
                pl.BlockSpec((hidden, 1), lambda i: (0, 0)),        # b1 resident
                pl.BlockSpec((out_dim, hidden), lambda i: (0, 0)),  # w2 resident
                pl.BlockSpec((out_dim, 1), lambda i: (0, 0)),       # b2 resident
            ],
            out_specs=pl.BlockSpec((out_dim, tile_b), lambda i: (0, i)),
        ),
        compiler_params=pltpu.CompilerParams(
            dimension_semantics=("parallel",),   # shard batch tiles across TCs (v7x)
        ),
        cost_estimate=cost,
    )(x_t, w1c, b1c, w2c, b2c)

    if b_pad != B:
        # Padded columns hold garbage (relu(b1) pushed through layer 2); drop them.
        out_t = out_t[:, :B]
    return out_t


_SMALL_BATCH_FAST_PATH = 512


def dqn_forward(x, w1, b1, w2, b2, *, tile_b=None,
                compute_dtype=jnp.bfloat16, out_dtype=jnp.float32,
                force_kernel=False):
    """PyTorch layout: x (B, 4) -> (B, 2)."""
    B = x.shape[0]
    if B < _SMALL_BATCH_FAST_PATH and not force_kernel:
        # Single env-step / action selection: plain fused XLA beats a pallas_call
        # (launch + pad-to-128 + transposes would dominate).
        h = jnp.maximum(jnp.dot(x, w1.T, preferred_element_type=jnp.float32) + b1, 0.0)
        return (jnp.dot(h, w2.T, preferred_element_type=jnp.float32) + b2).astype(out_dtype)
    out_t = dqn_forward_t(x.T, w1, b1, w2, b2, tile_b=tile_b,
                          compute_dtype=compute_dtype, out_dtype=out_dtype)
    return out_t.T


def init_params(key):
    # PyTorch default Linear init: U(-1/sqrt(fan_in), +1/sqrt(fan_in)),
    # weights stored [out_features, in_features] like nn.Linear.
    k1, k2, k3, k4 = jax.random.split(key, 4)
    bound1 = 1.0 / jnp.sqrt(4.0)
    bound2 = 1.0 / jnp.sqrt(32.0)
    w1 = jax.random.uniform(k1, (32, 4), jnp.float32, -bound1, bound1)
    b1 = jax.random.uniform(k2, (32,), jnp.float32, -bound1, bound1)
    w2 = jax.random.uniform(k3, (2, 32), jnp.float32, -bound2, bound2)
    b2 = jax.random.uniform(k4, (2,), jnp.float32, -bound2, bound2)
    return w1, b1, w2, b2


def _reference(x, w1, b1, w2, b2, compute_dtype=jnp.float32):
    xc, w1c, w2c = (a.astype(compute_dtype) for a in (x, w1, w2))
    h = jnp.dot(xc, w1c.T, preferred_element_type=jnp.float32) + b1
    h = jnp.maximum(h, 0.0).astype(compute_dtype)
    return jnp.dot(h, w2c.T, preferred_element_type=jnp.float32) + b2


if __name__ == "__main__":
    key = jax.random.PRNGKey(0)
    kx, kp, kx2 = jax.random.split(key, 3)
    w1, b1, w2, b2 = init_params(kp)

    # 1) Small batch through the feature-major kernel entry point (f32 compute,
    #    single 128-lane tile) — exercises the Pallas kernel, exact check.
    B = 8
    x = jax.random.normal(kx, (B, 4), jnp.float32)
    out_t = jax.block_until_ready(
        dqn_forward_t(x.T, w1, b1, w2, b2, compute_dtype=jnp.float32))
    ref = _reference(x, w1, b1, w2, b2, jnp.float32)
    assert out_t.shape == (2, B)
    assert jnp.allclose(out_t.T, ref, atol=1e-5, rtol=1e-5)

    # 2) Small batch via the PyTorch-layout wrapper: hits the fused-jnp fast path.
    out_fp = jax.block_until_ready(dqn_forward(x, w1, b1, w2, b2))
    assert out_fp.shape == (B, 2)
    assert jnp.allclose(out_fp, ref, atol=1e-5, rtol=1e-5)

    # 3) Larger, non-tile-aligned batch: multi-tile grid path, default bf16 compute.
    B2 = 300
    x2 = jax.random.normal(kx2, (B2, 4), jnp.float32)
    out2 = jax.block_until_ready(
        dqn_forward(x2, w1, b1, w2, b2, tile_b=128, force_kernel=True))
    ref2_bf16 = _reference(x2, w1, b1, w2, b2, jnp.bfloat16)
    ref2_f32 = _reference(x2, w1, b1, w2, b2, jnp.float32)
    assert out2.shape == (B2, 2)
    assert jnp.allclose(out2, ref2_bf16, atol=1e-3, rtol=1e-3)     # matches bf16 math
    assert jnp.allclose(out2, ref2_f32, atol=5e-2, rtol=5e-2)      # close to f32 math

    print("KERNEL_OK")
</pallas_src>

<mosaic_0001>
module attributes {stable_mosaic.version = 11 : i64} {
  func.func @dqn_kernel(%arg0: i32, %arg1: memref<4x128xf32, #tpu.memory_space<vmem>>, %arg2: memref<32x4xf32, #tpu.memory_space<vmem>>, %arg3: memref<32x1xf32, #tpu.memory_space<vmem>>, %arg4: memref<2x32xf32, #tpu.memory_space<vmem>>, %arg5: memref<2x1xf32, #tpu.memory_space<vmem>>, %arg6: memref<2x128xf32, #tpu.memory_space<vmem>>) attributes {dimension_semantics = [#tpu.dimension_semantics<parallel>], iteration_bounds = array<i64: 1>, scalar_prefetch = 0 : i64, scratch_operands = 0 : i64, tpu.core_type = #tpu.core_type<tc>, window_params = [{transform_indices = @transform_0, window_bounds = array<i64: 4, 128>}, {pipeline_mode = #tpu.pipeline_mode<synchronous>, transform_indices = @transform_1, window_bounds = array<i64: 32, 4>}, {pipeline_mode = #tpu.pipeline_mode<synchronous>, transform_indices = @transform_2, window_bounds = array<i64: 32, 1>}, {pipeline_mode = #tpu.pipeline_mode<synchronous>, transform_indices = @transform_3, window_bounds = array<i64: 2, 32>}, {pipeline_mode = #tpu.pipeline_mode<synchronous>, transform_indices = @transform_4, window_bounds = array<i64: 2, 1>}, {transform_indices = @transform_5, window_bounds = array<i64: 2, 128>}]} {
    %c0 = arith.constant 0 : index
    %c0_0 = arith.constant 0 : index
    %0 = vector.load %arg2[%c0, %c0_0] : memref<32x4xf32, #tpu.memory_space<vmem>>, vector<32x4xf32>
    %c0_1 = arith.constant 0 : index
    %c0_2 = arith.constant 0 : index
    %1 = vector.load %arg1[%c0_1, %c0_2] : memref<4x128xf32, #tpu.memory_space<vmem>>, vector<4x128xf32>
    %cst = arith.constant dense<0.000000e+00> : vector<32x128xf32>
    %2 = tpu.matmul %0, %1, %cst {dimension_numbers = #tpu.dot_dimension_numbers<[1], [0], [0], [1], [0, 0, 1, 1], [], []>} : vector<32x4xf32>, vector<4x128xf32>, vector<32x128xf32> -> vector<32x128xf32>
    %c0_3 = arith.constant 0 : index
    %c0_4 = arith.constant 0 : index
    %3 = vector.load %arg3[%c0_3, %c0_4] : memref<32x1xf32, #tpu.memory_space<vmem>>, vector<32x1xf32>
    %4 = vector.broadcast %3 : vector<32x1xf32> to vector<32x128xf32>
    %5 = arith.addf %2, %4 : vector<32x128xf32>
    %cst_5 = arith.constant 0.000000e+00 : f32
    %6 = vector.broadcast %cst_5 : f32 to vector<32x128xf32>
    %7 = arith.maximumf %5, %6 : vector<32x128xf32>
    %c0_6 = arith.constant 0 : index
    %c0_7 = arith.constant 0 : index
    %8 = vector.load %arg4[%c0_6, %c0_7] : memref<2x32xf32, #tpu.memory_space<vmem>>, vector<2x32xf32>
    %cst_8 = arith.constant dense<0.000000e+00> : vector<2x128xf32>
    %9 = tpu.matmul %8, %7, %cst_8 {dimension_numbers = #tpu.dot_dimension_numbers<[1], [0], [0], [1], [0, 0, 1, 1], [], []>} : vector<2x32xf32>, vector<32x128xf32>, vector<2x128xf32> -> vector<2x128xf32>
    %c0_9 = arith.constant 0 : index
    %c0_10 = arith.constant 0 : index
    %10 = vector.load %arg5[%c0_9, %c0_10] : memref<2x1xf32, #tpu.memory_space<vmem>>, vector<2x1xf32>
    %11 = vector.broadcast %10 : vector<2x1xf32> to vector<2x128xf32>
    %12 = arith.addf %9, %11 : vector<2x128xf32>
    %c0_11 = arith.constant 0 : index
    %c0_12 = arith.constant 0 : index
    %13 = vector.load %arg6[%c0_11, %c0_12] : memref<2x128xf32, #tpu.memory_space<vmem>>, vector<2x128xf32>
    tpu.vector_store %arg6[%c0_11, %c0_12], %12 {strides = array<i32>} : memref<2x128xf32, #tpu.memory_space<vmem>>, vector<2x128xf32>,
    return
  }
  func.func @transform_0(%arg0: i32) -> (i32, i32) {
    %c0_i32 = arith.constant 0 : i32
    %c0_i32_0 = arith.constant 0 : i32
    return %c0_i32, %arg0 : i32, i32
  }
  func.func @transform_1(%arg0: i32) -> (i32, i32) {
    %c0_i32 = arith.constant 0 : i32
    %c0_i32_0 = arith.constant 0 : i32
    %c0_i32_1 = arith.constant 0 : i32
    return %c0_i32, %c0_i32_0 : i32, i32
  }
  func.func @transform_2(%arg0: i32) -> (i32, i32) {
    %c0_i32 = arith.constant 0 : i32
    %c0_i32_0 = arith.constant 0 : i32
    %c0_i32_1 = arith.constant 0 : i32
    return %c0_i32, %c0_i32_0 : i32, i32
  }
  func.func @transform_3(%arg0: i32) -> (i32, i32) {
    %c0_i32 = arith.constant 0 : i32
    %c0_i32_0 = arith.constant 0 : i32
    %c0_i32_1 = arith.constant 0 : i32
    return %c0_i32, %c0_i32_0 : i32, i32
  }
  func.func @transform_4(%arg0: i32) -> (i32, i32) {
    %c0_i32 = arith.constant 0 : i32
    %c0_i32_0 = arith.constant 0 : i32
    %c0_i32_1 = arith.constant 0 : i32
    return %c0_i32, %c0_i32_0 : i32, i32
  }
  func.func @transform_5(%arg0: i32) -> (i32, i32) {
    %c0_i32 = arith.constant 0 : i32
    %c0_i32_0 = arith.constant 0 : i32
    return %c0_i32, %arg0 : i32, i32
  }
}

</mosaic_0001>

<bundles_post_ra>
// kernel: tpu_custom_call.1
= control target key start
LH: loop header
LB: loop body
LE: loop exit
PB: predicated region body
PF: predicated region fallthrough
CT: control target
= control target key end

     0   :  { %vm63_vm0 = vcmask 1043456   ;;  %vm50_vm1 = vcmask 31744   ;;  %v315_v5 = vmov 0   ;;  %s389_s0 = inlined_call_operand.vmem [shape: f32[4,128], index: 0, kind: input, shape index: {}]   ;;  %s390_s1 = inlined_call_operand.vmem [shape: f32[32,4], index: 1, kind: input, shape index: {}]   ;;  %s391_s2 = inlined_call_operand.vmem [shape: f32[32,1], index: 2, kind: input, shape index: {}]   ;;  %s392_s3 = inlined_call_operand.vmem [shape: f32[2,32], index: 3, kind: input, shape index: {}]   ;;  %s393_s4 = inlined_call_operand.vmem [shape: f32[2,1], index: 4, kind: input, shape index: {}]   ;;  %s394_s5 = inlined_call_operand.hbm [shape: f32[2,128], index: 5, kind: output, shape index: {}]  }
   0x1   :  { %v25_v0 = vld [vmem:[%s389_s0] sm:$0xf]  ;;  %v22_v2 = vld [vmem:[%s390_s1 + $0x8] sm:$0xff]  ;;  %v23_v3 = vld [vmem:[%s390_s1 + $0x10] sm:$0xff]  ;;  %291 = vset.pattern.permute.xlu0 %v315_v5 }
   0x2   :  { %v21_v1 = vld [vmem:[%s390_s1] sm:$0xff]  ;;  %268 = vmatprep.subr.msk.mxu0 %vm63_vm0, %v25_v0  ;;  %v29_v4 = vld [vmem:[%s391_s2 + $0x18] sm:$0xff]  ;;  %v27_v6 = vld [vmem:[%s391_s2 + $0x8] sm:$0xff] }
   0x3   :  { %270 = vmatprep.mubr.msk.f32.mxu0 %vm50_vm1, %v21_v1  ;;  %269 = vmatpush3.msk.msra.mxu0 %vm63_vm0, %v25_v0 }
   0x4   :  { %271 = vmatmul.mubr.msk.f32.vlgmr.msra.gmra.mxu0 %vm50_vm1, %v22_v2  ;;  %47 = vperm.xlu0 %291, %v29_v4  }
   0x5   :  { %10 = vsyncpa [#allocation3], 0  ;;  %273 = vmatprep.mubr.msk.f32.mxu0 %vm50_vm1, %v23_v3  ;;  %v24_v7 = vld [vmem:[%s390_s1 + $0x18] sm:$0xff]  ;;  %292 = vset.pattern.permute.xlu1 %v315_v5  ;;  %v28_v8 = vld [vmem:[%s391_s2 + $0x10] sm:$0xff]  ;;  %v316_v11 = vmov 0.0   ;;  %vm317_vm2 = vmmov 0  }
   0x6   :  { %37 = vperm.xlu1 %292, %v27_v6   ;;  %v26_v9 = vld [vmem:[%s391_s2] sm:$0xff]  ;;  %276 = vmatprep.subr.mxu1 %v316_v11  ;;  %vm163_vm3 = vcmask 261120  }
   0x7   :  { %v157_v10 = vld [vmem:[%s393_s4] sm:$0x3]  ;;  %284 = vmatprep.mubr.msk.f32.mxu1 %vm317_vm2, %v316_v11  ;;  %s318_s4 = smov [#allocation2]  }
   0x8   :  { %274 = vmatmul.mubr.msk.f32.gmra.mxu0 %vm50_vm1, %v24_v7  ;;  %42 = vperm.xlu0 %291, %v28_v8   ;;  %v156_v28 = vld [vmem:[%s392_s3] sm:$0x3]  ;;  %s244_s12 = sshll.u32 %s318_s4, 4  ;;  %s245_s12 = int_to_ptr.vmem [resolvable:$true] %s244_s12 }
   0x9   :  { %s293_s13 = scalar_lea.vmem %s245_s12, 32  ;;  %p298_p1 = scmp.lt.s32.totalorder %s245_s12, %s245_s12 }
   0xa   :  { %32 = vperm.xlu1 %292, %v26_v9   ;;  %p294_p0 = scmp.ne.s32.totalorder %s245_s12, %s293_s13  ;;  %p299_p2 = scmp.lt.s32.totalorder %s293_s13, %s293_s13 }
   0xc   :  { %160 = vperm.xlu0 %291, %v157_v10   ;;  %p300_p3 = por %p299_p2, %p298_p1 }
   0xe   :  { %p301_p4 = pnand %p300_p3, %p294_p0 }
  0x7f   :  { %v48_v12 = vpop.permute.xlu0 %47 }
  0x81   :  { %v38_v13 = vpop.permute.xlu1 %37 }
  0x83   :  { %v43_v17 = vpop.permute.xlu0 %42 }
  0x85   :  { %v33_v19 = vpop.permute.xlu1 %32 }
  0x87   :  { %v161_v29 = vpop.permute.xlu0 %160 }
  0xc4   :  { %v272_v14 = vpop.f32.mrf.mxu0 }
  0xc5   :  { %v139_v21 = vadd.f32 %v272_v14, %v38_v13 }
  0xc6   :  { %v133_v15 = vpop.f32.mrf.mxu0 }
  0xc7   :  { %v134_v24 = vadd.f32 %v133_v15, %v33_v19  ;;  %v153_v26 = vmax.f32 %v139_v21, 0.0 }
  0xc8   :  { %v275_v16 = vpop.f32.mrf.mxu0 }
  0xc9   :  { %v149_v18 = vadd.f32 %v275_v16, %v48_v12  ;;  %v152_v27 = vmax.f32 %v134_v24, 0.0 }
  0xca   :  { %v143_v20 = vpop.f32.mrf.mxu0 }
  0xcb   :  { %v155_v22 = vmax.f32 %v149_v18, 0.0  ;;  %v144_v23 = vadd.f32 %v143_v20, %v43_v17 }
  0xcd   :  { %v154_v25 = vmax.f32 %v144_v23, 0.0  ;;  %277 = vmatpush3.msra.mxu1 %v155_v22 }
  0xce   :  { %278 = vmatprep.subr.mxu1 %v316_v11 }
  0xcf   :  { %279 = vmatpush3.msra.mxu1 %v154_v25 }
  0xd0   :  { %280 = vmatprep.subr.mxu1 %v316_v11 }
  0xd1   :  { %281 = vmatpush3.msra.mxu1 %v153_v26 }
  0xd2   :  { %282 = vmatprep.subr.mxu1 %v316_v11 }
  0xd3   :  { %283 = vmatpush3.msra.mxu1 %v152_v27 }
  0xd4   :  { %285 = vmatmul.mubr.msk.f32.vlgmr.msra.gmra.mxu1 %vm163_vm3, %v156_v28 }
 0x194   :  { %v233_v30 = vpop.f32.mrf.mxu1 }
 0x195   :  { %v234_v31 = vadd.f32 %v233_v30, %v161_v29 }
 0x196   :  { %v286_v32 = vpop.f32.mrf.mxu1 }
 0x197   :  { %237 = vst [vmem:[#allocation2] sm:$0x3] %v234_v31 }
 0x198   :  { %304 = shalt.err (!%p301_p4)
}
 0x199   :  { %247 = dma.vmem_to_hbm [thread:$0]  %s245_s12, 32, %s394_s5, [#allocation3]  }
 0x19a   :  { %313 = dma.done.wait [#allocation3], 32  }
 0x19b   :  { %314 = vsyncadd [#allocation3], 4294967264 }
 0x19c   :  { %251 = vsyncpa [#allocation3], 1 }

</bundles_post_ra>
